<compile_context>
chip_gen: v6e
topology: v6e:2x2x1
jax: 0.10.0
libtpu: 0.0.40
codegen_flags: <defaults>
</compile_context>

<pallas_src>
import functools

import jax
import jax.numpy as jnp
from jax import lax
from jax.experimental import pallas as pl
from jax.experimental.pallas import tpu as pltpu

K = 4        # every ConvTranspose2d in Generator64 uses a 4x4 kernel
EPS = 1e-5   # BatchNorm2d default eps


# ---------------------------------------------------------------------------
# Pallas kernels
# ---------------------------------------------------------------------------
def _matmul_kernel(x_ref, w_ref, o_ref):
    # (tm, Cin) @ (Cin, K*K*Cout) on the MXU.  K*K*Cout is a multiple of 128,
    # so every store is an unmasked, lane-dense vst.
    o_ref[...] = jnp.dot(x_ref[...], w_ref[...],
                         preferred_element_type=jnp.float32)


def _bn_relu_kernel(y_ref, g_ref, b_ref, o_ref, *, inv_m):
    # Fused BatchNorm (training-mode batch statistics) + affine + ReLU in a
    # single pass over the feature map held entirely in VMEM.
    y = y_ref[...]
    s = jnp.sum(y, axis=0, keepdims=True)
    sq = jnp.sum(y * y, axis=0, keepdims=True)
    mean = s * inv_m
    var = jnp.maximum(sq * inv_m - mean * mean, 0.0)   # clamp E[x^2]-E[x]^2
    scale = g_ref[...] * lax.rsqrt(var + EPS)
    shift = b_ref[...] - mean * scale
    o_ref[...] = jnp.maximum(y * scale + shift, 0.0)


def _tanh_kernel(x_ref, o_ref):
    o_ref[...] = jnp.tanh(x_ref[...])


# ---------------------------------------------------------------------------
# Pallas wrappers
# ---------------------------------------------------------------------------
def _pick_tm(m):
    if m <= 1024:
        return m
    for tm in (1024, 512, 256, 128, 64, 32, 16, 8):
        if m % tm == 0:
            return tm
    return m


def _pallas_matmul(x2d, w2d):
    m0, cin = x2d.shape
    ncols = w2d.shape[1]
    m = ((m0 + 7) // 8) * 8            # keep sublane dim a multiple of 8
    if m != m0:
        x2d = jnp.pad(x2d, ((0, m - m0), (0, 0)))
    tm = _pick_tm(m)
    y = pl.pallas_call(
        _matmul_kernel,
        out_shape=jax.ShapeDtypeStruct((m, ncols), jnp.float32),
        grid=(m // tm,),
        in_specs=[
            pl.BlockSpec((tm, cin), lambda i: (i, 0)),
            pl.BlockSpec((cin, ncols), lambda i: (0, 0)),
        ],
        out_specs=pl.BlockSpec((tm, ncols), lambda i: (i, 0)),
        compiler_params=pltpu.CompilerParams(
            dimension_semantics=("parallel",)),   # no accumulator -> megacore OK
    )(x2d, w2d)
    return y[:m0] if m != m0 else y


def _pallas_bn_relu(y2d, gamma, beta):
    # Single-block fused pass: per-layer feature maps at this batch size are
    # tiny (<= a few hundred KB), so the whole (M, C) map lives in VMEM.
    m, c = y2d.shape
    kernel = functools.partial(_bn_relu_kernel, inv_m=1.0 / m)
    return pl.pallas_call(
        kernel,
        out_shape=jax.ShapeDtypeStruct((m, c), jnp.float32),
        grid=(1,),
        in_specs=[
            pl.BlockSpec((m, c), lambda i: (0, 0)),
            pl.BlockSpec((1, c), lambda i: (0, 0)),
            pl.BlockSpec((1, c), lambda i: (0, 0)),
        ],
        out_specs=pl.BlockSpec((m, c), lambda i: (0, 0)),
    )(y2d, gamma.reshape(1, c), beta.reshape(1, c))


def _pallas_tanh(x2d):
    r, l = x2d.shape
    return pl.pallas_call(
        _tanh_kernel,
        out_shape=jax.ShapeDtypeStruct((r, l), jnp.float32),
        grid=(1,),
        in_specs=[pl.BlockSpec((r, l), lambda i: (0, 0))],
        out_specs=pl.BlockSpec((r, l), lambda i: (0, 0)),
    )(x2d)


# ---------------------------------------------------------------------------
# Plain-JAX glue: weight reshape + dense col2im overlap-add (no scatter)
# ---------------------------------------------------------------------------
def _w2d_from_torch_wt(wt):
    # wt: PyTorch ConvTranspose2d weight (Cin, Cout, K, K).  The direct
    # (scatter-form) transposed conv needs no spatial flip:
    #   out[n, i*s-p+kh, j*s-p+kw, co] += x[n, i, j, ci] * wt[ci, co, kh, kw]
    cin, cout = wt.shape[0], wt.shape[1]
    w2d = jnp.transpose(wt, (0, 2, 3, 1)).reshape(cin, K * K * cout)
    ncols = w2d.shape[1]
    lane_pad = (-ncols) % 128
    if lane_pad:
        w2d = jnp.pad(w2d, ((0, 0), (0, lane_pad)))  # lane-dense stores
    return w2d, ncols


def _col2im(ycols, n, hin, win, cout, stride, pad):
    """Dense overlap-add of per-input-pixel KxKxCout patches (no scatter)."""
    y = ycols.reshape(n, hin, win, K, K, cout)
    if stride == 1:
        hfull, wfull = hin + K - 1, win + K - 1
        out = jnp.zeros((n, hfull, wfull, cout), ycols.dtype)
        for kh in range(K):
            for kw in range(K):
                out = out + jnp.pad(
                    y[:, :, :, kh, kw, :],
                    ((0, 0), (kh, K - 1 - kh), (kw, K - 1 - kw), (0, 0)))
    elif stride == 2:
        # 4-phase sub-pixel decomposition: output pixel (2a+rh, 2b+rw) only
        # receives taps kh=2qh+rh, kw=2qw+rw from input pixel (a-qh, b-qw).
        hp, wp = hin + 1, win + 1
        yp = jnp.pad(y, ((0, 0), (1, 1), (1, 1), (0, 0), (0, 0), (0, 0)))
        phases = []
        for rh in range(2):
            for rw in range(2):
                acc = jnp.zeros((n, hp, wp, cout), ycols.dtype)
                for qh in range(2):
                    for qw in range(2):
                        acc = acc + yp[:, 1 - qh:1 - qh + hp,
                                       1 - qw:1 - qw + wp,
                                       2 * qh + rh, 2 * qw + rw, :]
                phases.append(acc)
        ph = jnp.stack(phases, axis=0).reshape(2, 2, n, hp, wp, cout)
        out = jnp.transpose(ph, (2, 3, 0, 4, 1, 5)).reshape(
            n, 2 * hp, 2 * wp, cout)
        hfull, wfull = 2 * hp, 2 * wp
    else:
        raise NotImplementedError("Generator64 only uses stride 1 or 2")
    hout = hfull - 2 * pad
    wout = wfull - 2 * pad
    return out[:, pad:pad + hout, pad:pad + wout, :]


def conv_transpose_nhwc(x_nhwc, wt, stride, pad):
    n, hin, win, cin = x_nhwc.shape
    cout = wt.shape[1]
    w2d, ncols = _w2d_from_torch_wt(wt)
    x2d = x_nhwc.reshape(n * hin * win, cin)
    ycols = _pallas_matmul(x2d, w2d)[:, :ncols]
    return _col2im(ycols, n, hin, win, cout, stride, pad)


# ---------------------------------------------------------------------------
# Generator64 forward
# ---------------------------------------------------------------------------
def layer_t_forward(x_nhwc, wt, gamma, beta, stride, pad):
    y = conv_transpose_nhwc(x_nhwc, wt, stride, pad)
    n, h, w, c = y.shape
    out = _pallas_bn_relu(y.reshape(n * h * w, c), gamma, beta)
    return out.reshape(n, h, w, c)


def finisher_forward(x_nhwc, wt):
    y = conv_transpose_nhwc(x_nhwc, wt, stride=2, pad=1)
    n, h, w, c = y.shape
    total = n * h * w * c
    if total % 128 == 0:
        flat = y.reshape(total // 128, 128)   # fully lane-dense tanh pass
    else:
        flat = y.reshape(n * h * w, c)
    return _pallas_tanh(flat).reshape(n, h, w, c)


def init_params(latent_size, key):
    cfgs = [(latent_size, 96, 1, 0), (96, 96, 2, 1), (96, 64, 2, 1), (64, 32, 2, 1)]
    params = {"layers": []}
    for (cin, cout, s, p) in cfgs:
        key, k1, k2 = jax.random.split(key, 3)
        params["layers"].append({
            "wt": 0.02 * jax.random.normal(k1, (cin, cout, K, K), jnp.float32),
            "gamma": 1.0 + 0.02 * jax.random.normal(k2, (cout,), jnp.float32),
            "beta": jnp.zeros((cout,), jnp.float32),
            "stride": s,
            "pad": p,
        })
    key, kf = jax.random.split(key)
    params["fin_w"] = 0.02 * jax.random.normal(kf, (32, 3, K, K), jnp.float32)
    return params


def generator64_forward(x_nchw, params):
    x = jnp.transpose(x_nchw, (0, 2, 3, 1))           # NCHW -> NHWC (internal)
    for lp in params["layers"]:
        x = layer_t_forward(x, lp["wt"], lp["gamma"], lp["beta"],
                            lp["stride"], lp["pad"])
    x = finisher_forward(x, params["fin_w"])
    return jnp.transpose(x, (0, 3, 1, 2))             # NHWC -> NCHW (PyTorch)


# ---------------------------------------------------------------------------
# Pure-JAX reference (for correctness check only)
# ---------------------------------------------------------------------------
def _ref_conv_transpose(x_nchw, wt, stride, pad):
    w_oihw = jnp.transpose(wt[:, :, ::-1, ::-1], (1, 0, 2, 3))
    p = K - 1 - pad
    return lax.conv_general_dilated(
        x_nchw, w_oihw, window_strides=(1, 1), padding=[(p, p), (p, p)],
        lhs_dilation=(stride, stride),
        dimension_numbers=("NCHW", "OIHW", "NCHW"))


def reference_forward(x_nchw, params):
    x = x_nchw
    for lp in params["layers"]:
        x = _ref_conv_transpose(x, lp["wt"], lp["stride"], lp["pad"])
        mean = jnp.mean(x, axis=(0, 2, 3), keepdims=True)
        var = jnp.mean(x * x, axis=(0, 2, 3), keepdims=True) - mean * mean
        g = lp["gamma"].reshape(1, -1, 1, 1)
        b = lp["beta"].reshape(1, -1, 1, 1)
        x = jnp.maximum((x - mean) / jnp.sqrt(var + EPS) * g + b, 0.0)
    x = _ref_conv_transpose(x, params["fin_w"], 2, 1)
    return jnp.tanh(x)


if __name__ == "__main__":
    latent_size = 16
    batch = 2
    key = jax.random.PRNGKey(0)
    kx, kp = jax.random.split(key)
    x = jax.random.normal(kx, (batch, latent_size, 1, 1), jnp.float32)
    params = init_params(latent_size, kp)

    out = jax.block_until_ready(generator64_forward(x, params))
    assert out.shape == (batch, 3, 64, 64), out.shape

    ref = jax.block_until_ready(reference_forward(x, params))
    err = float(jnp.max(jnp.abs(out - ref)))
    assert jnp.allclose(out, ref, atol=1e-2, rtol=1e-2), err

    print("KERNEL_OK")
</pallas_src>

<mosaic_0001>
module attributes {stable_mosaic.version = 11 : i64} {
  func.func @_matmul_kernel(%arg0: i32, %arg1: memref<8x16xf32, #tpu.memory_space<vmem>>, %arg2: memref<16x1536xf32, #tpu.memory_space<vmem>>, %arg3: memref<8x1536xf32, #tpu.memory_space<vmem>>) attributes {dimension_semantics = [#tpu.dimension_semantics<parallel>], iteration_bounds = array<i64: 1>, scalar_prefetch = 0 : i64, scratch_operands = 0 : i64, tpu.core_type = #tpu.core_type<tc>, window_params = [{transform_indices = @transform_0, window_bounds = array<i64: 8, 16>}, {pipeline_mode = #tpu.pipeline_mode<synchronous>, transform_indices = @transform_1, window_bounds = array<i64: 16, 1536>}, {transform_indices = @transform_2, window_bounds = array<i64: 8, 1536>}]} {
    %c0 = arith.constant 0 : index
    %c0_0 = arith.constant 0 : index
    %0 = vector.load %arg1[%c0, %c0_0] : memref<8x16xf32, #tpu.memory_space<vmem>>, vector<8x16xf32>
    %c0_1 = arith.constant 0 : index
    %c0_2 = arith.constant 0 : index
    %1 = vector.load %arg2[%c0_1, %c0_2] : memref<16x1536xf32, #tpu.memory_space<vmem>>, vector<16x1536xf32>
    %cst = arith.constant dense<0.000000e+00> : vector<8x1536xf32>
    %2 = tpu.matmul %0, %1, %cst {dimension_numbers = #tpu.dot_dimension_numbers<[1], [0], [0], [1], [0, 0, 1, 1], [], []>} : vector<8x16xf32>, vector<16x1536xf32>, vector<8x1536xf32> -> vector<8x1536xf32>
    %c0_3 = arith.constant 0 : index
    %c0_4 = arith.constant 0 : index
    %3 = vector.load %arg3[%c0_3, %c0_4] : memref<8x1536xf32, #tpu.memory_space<vmem>>, vector<8x1536xf32>
    tpu.vector_store %arg3[%c0_3, %c0_4], %2 {strides = array<i32>} : memref<8x1536xf32, #tpu.memory_space<vmem>>, vector<8x1536xf32>,
    return
  }
  func.func @transform_0(%arg0: i32) -> (i32, i32) {
    %c0_i32 = arith.constant 0 : i32
    %c0_i32_0 = arith.constant 0 : i32
    return %arg0, %c0_i32 : i32, i32
  }
  func.func @transform_1(%arg0: i32) -> (i32, i32) {
    %c0_i32 = arith.constant 0 : i32
    %c0_i32_0 = arith.constant 0 : i32
    %c0_i32_1 = arith.constant 0 : i32
    return %c0_i32, %c0_i32_0 : i32, i32
  }
  func.func @transform_2(%arg0: i32) -> (i32, i32) {
    %c0_i32 = arith.constant 0 : i32
    %c0_i32_0 = arith.constant 0 : i32
    return %arg0, %c0_i32 : i32, i32
  }
}

</mosaic_0001>

<bundles_post_ra>
// kernel: tpu_custom_call.1
= control target key start
LH: loop header
LB: loop body
LE: loop exit
PB: predicated region body
PF: predicated region fallthrough
CT: control target
= control target key end

     0   :  { %7 = vsyncpa [#allocation3], 0  ;;  %s635_s0 = inlined_call_operand.hbm [shape: f32[8,16], index: 0, kind: input, shape index: {}]   ;;  %s636_s1 = inlined_call_operand.hbm [shape: f32[16,1536], index: 1, kind: input, shape index: {}]   ;;  %s637_s2 = inlined_call_operand.hbm [shape: f32[8,1536], index: 2, kind: output, shape index: {}]  }
   0x1   :  { %8 = vsyncpa [#allocation6], 0 }
   0x2   :  { %9 = vsyncpa [#allocation4], 0  ;;  %s599_s9 = smov [#allocation2]   ;;  %s600_s11 = smov [#allocation5]  }
   0x3   :  { %s16_s10 = sshll.u32 %s599_s9, 4  ;;  %s25_s12 = sshll.u32 %s600_s11, 4  ;;  %s17_s10 = int_to_ptr.vmem [resolvable:$true] %s16_s10  ;;  %s26_s12 = int_to_ptr.vmem [resolvable:$true] %s25_s12 }
   0x4   :  { %s541_s13 = scalar_lea.vmem %s17_s10, 128  ;;  %p546_p1 = scmp.lt.s32.totalorder %s17_s10, %s17_s10 }
   0x5   :  { %p542_p0 = scmp.ne.s32.totalorder %s17_s10, %s541_s13  ;;  %p547_p2 = scmp.lt.s32.totalorder %s541_s13, %s541_s13 }
   0x7   :  { %p548_p3 = por %p547_p2, %p546_p1 }
   0x9   :  { %p549_p4 = pnand %p548_p3, %p542_p0 }
   0xb   :  { %552 = shalt.err (!%p549_p4)
}
   0xc   :  { %19 = dma.hbm_to_vmem [thread:$0]  %s635_s0, 128, %s17_s10, [#allocation3]  }
   0xd   :  { %s561_s16 = scalar_lea.vmem %s26_s12, 3072  ;;  %p566_p6 = scmp.lt.s32.totalorder %s26_s12, %s26_s12 }
   0xe   :  { %p562_p5 = scmp.ne.s32.totalorder %s26_s12, %s561_s16  ;;  %p567_p7 = scmp.lt.s32.totalorder %s561_s16, %s561_s16 }
  0x10   :  { %p568_p8 = por %p567_p7, %p566_p6 }
  0x12   :  { %p569_p9 = pnand %p568_p8, %p562_p5 }
  0x14   :  { %572 = shalt.err (!%p569_p9)
}
  0x15   :  { %s601_s17 = smov 1536   ;;  %s602_s18 = smov 96  }
  0x16   :  { %31 = dma.hbm_to_vmem [thread:$0]  %s636_s1, 3072, %s26_s12, [#allocation6], %s601_s17, %s601_s17, %s602_s18  }
  0x17   :  { %593 = dma.done.wait [#allocation3], 128  }
  0x18   :  { %594 = vsyncadd [#allocation3], 4294967168 }
  0x19   :  { %595 = dma.done.wait [#allocation6], 3072  }
  0x1a   :  { %596 = vsyncadd [#allocation6], 4294964224  ;;  %v603_v0 = vmov 0.0   ;;  %v52_v1 = vld [vmem:[#allocation5 + $0x68] sm:$0xff]  ;;  %v54_v2 = vld [vmem:[#allocation5 + $0x78] sm:$0xff]  ;;  %vm63_vm0 = vcmask 130048  }
  0x1b   :  { %131 = vmatprep.mubr.f32.mxu0 %v603_v0  ;;  %202 = vmatprep.mubr.f32.mxu1 %v603_v0  ;;  %v51_v3 = vld [vmem:[#allocation5 + $0x60] sm:$0xff]  ;;  %v53_v4 = vld [vmem:[#allocation5 + $0x70] sm:$0xff]  ;;  %v40_v5 = vld [vmem:[#allocation5 + $0x8] sm:$0xff]  ;;  %s604_s0 = smov [#allocation7]  }
  0x1c   :  { %95 = vmatprep.subr.mxu0 %v52_v1  ;;  %166 = vmatprep.subr.mxu1 %v54_v2  ;;  %v42_v6 = vld [vmem:[#allocation5 + $0x18] sm:$0xff]  ;;  %v39_v7 = vld [vmem:[#allocation5] sm:$0xff]  ;;  %v41_v8 = vld [vmem:[#allocation5 + $0x10] sm:$0xff]  ;;  %s511_s1 = sshll.u32 %s604_s0, 4  ;;  %s512_s1 = int_to_ptr.vmem [resolvable:$true] %s511_s1 }
  0x1d   :  { %96 = vmatpush1.msra.mxu0 %v51_v3  ;;  %167 = vmatpush1.msra.mxu1 %v53_v4  ;;  %v38_v9 = vld [vmem:[#allocation2] sm:$0xff]  ;;  %v56_v10 = vld [vmem:[#allocation5 + $0x88] sm:$0xff]  ;;  %v55_v12 = vld [vmem:[#allocation5 + $0x80] sm:$0xff]  ;;  %s573_s21 = scalar_lea.vmem %s512_s1, 1536  ;;  %p578_p11 = scmp.lt.s32.totalorder %s512_s1, %s512_s1 }
  0x1e   :  { %97 = vmatprep.subr.mxu0 %v40_v5  ;;  %168 = vmatprep.subr.mxu1 %v42_v6  ;;  %v58_v11 = vld [vmem:[#allocation5 + $0x98] sm:$0xff]  ;;  %v57_v13 = vld [vmem:[#allocation5 + $0x90] sm:$0xff]  ;;  %v44_v14 = vld [vmem:[#allocation5 + $0x28] sm:$0xff]  ;;  %p574_p10 = scmp.ne.s32.totalorder %s512_s1, %s573_s21  ;;  %p579_p12 = scmp.lt.s32.totalorder %s573_s21, %s573_s21 }
  0x1f   :  { %98 = vmatpush1.msra.mxu0 %v39_v7  ;;  %169 = vmatpush1.msra.mxu1 %v41_v8  ;;  %v46_v15 = vld [vmem:[#allocation5 + $0x38] sm:$0xff]  ;;  %v43_v16 = vld [vmem:[#allocation5 + $0x20] sm:$0xff]  ;;  %v45_v17 = vld [vmem:[#allocation5 + $0x30] sm:$0xff] }
  0x20   :  { %521 = vmatmul.mubr.msk.f32.vlgmr.msra.gmra.mxu0 %vm63_vm0, %v38_v9  ;;  %522 = vmatmul.mubr.msk.f32.vlgmr.msra.gmra.mxu1 %vm63_vm0, %v38_v9  ;;  %v60_v18 = vld [vmem:[#allocation5 + $0xa8] sm:$0xff]  ;;  %v62_v19 = vld [vmem:[#allocation5 + $0xb8] sm:$0xff]  ;;  %v59_v20 = vld [vmem:[#allocation5 + $0xa0] sm:$0xff]  ;;  %p580_p13 = por %p579_p12, %p578_p11 }
  0x21   :  { %237 = vmatprep.subr.mxu0 %v56_v10  ;;  %308 = vmatprep.subr.mxu1 %v58_v11  ;;  %v61_v21 = vld [vmem:[#allocation5 + $0xb0] sm:$0xff]  ;;  %v48_v22 = vld [vmem:[#allocation5 + $0x48] sm:$0xff]  ;;  %v50_v23 = vld [vmem:[#allocation5 + $0x58] sm:$0xff] }
  0x22   :  { %238 = vmatpush1.msra.mxu0 %v55_v12  ;;  %309 = vmatpush1.msra.mxu1 %v57_v13  ;;  %v47_v24 = vld [vmem:[#allocation5 + $0x40] sm:$0xff]  ;;  %v49_v25 = vld [vmem:[#allocation5 + $0x50] sm:$0xff]  ;;  %p581_p0 = pnand %p580_p13, %p574_p10 }
  0x23   :  { %239 = vmatprep.subr.mxu0 %v44_v14  ;;  %310 = vmatprep.subr.mxu1 %v46_v15 }
  0x24   :  { %240 = vmatpush1.msra.mxu0 %v43_v16  ;;  %273 = vmatprep.mubr.f32.mxu0 %v603_v0 }
  0x25   :  { %311 = vmatpush1.msra.mxu1 %v45_v17  ;;  %344 = vmatprep.mubr.f32.mxu1 %v603_v0 }
  0x26   :  { %523 = vmatmul.mubr.msk.f32.vlgmr.msra.gmra.mxu0 %vm63_vm0, %v38_v9  ;;  %524 = vmatmul.mubr.msk.f32.vlgmr.msra.gmra.mxu1 %vm63_vm0, %v38_v9 }
  0x27   :  { %379 = vmatprep.subr.mxu0 %v60_v18  ;;  %450 = vmatprep.subr.mxu1 %v62_v19 }
  0x28   :  { %380 = vmatpush1.msra.mxu0 %v59_v20  ;;  %451 = vmatpush1.msra.mxu1 %v61_v21 }
  0x29   :  { %381 = vmatprep.subr.mxu0 %v48_v22  ;;  %452 = vmatprep.subr.mxu1 %v50_v23 }
  0x2a   :  { %382 = vmatpush1.msra.mxu0 %v47_v24  ;;  %415 = vmatprep.mubr.f32.mxu0 %v603_v0 }
  0x2b   :  { %453 = vmatpush1.msra.mxu1 %v49_v25  ;;  %486 = vmatprep.mubr.f32.mxu1 %v603_v0 }
  0x2c   :  { %525 = vmatmul.mubr.msk.f32.vlgmr.msra.gmra.mxu0 %vm63_vm0, %v38_v9  ;;  %526 = vmatmul.mubr.msk.f32.vlgmr.msra.gmra.mxu1 %vm63_vm0, %v38_v9 }
  0xe0   :  { %v133_v26 = vpop.f32.mrf.mxu0  ;;  %v204_v27 = vpop.f32.mrf.mxu1 }
  0xe1   :  { %493 = vst [vmem:[#allocation7] sm:$0xff] %v133_v26  ;;  %495 = vst [vmem:[#allocation7 + $0x10] sm:$0xff] %v204_v27 }
  0xe2   :  { %v135_v28 = vpop.f32.mrf.mxu0  ;;  %v206_v29 = vpop.f32.mrf.mxu1 }
  0xe3   :  { %494 = vst [vmem:[#allocation7 + $0x8] sm:$0xff] %v135_v28  ;;  %496 = vst [vmem:[#allocation7 + $0x18] sm:$0xff] %v206_v29 }
  0xe6   :  { %v275_v30 = vpop.f32.mrf.mxu0  ;;  %v346_v31 = vpop.f32.mrf.mxu1 }
  0xe7   :  { %497 = vst [vmem:[#allocation7 + $0x20] sm:$0xff] %v275_v30  ;;  %499 = vst [vmem:[#allocation7 + $0x30] sm:$0xff] %v346_v31 }
  0xe8   :  { %v277_v32 = vpop.f32.mrf.mxu0  ;;  %v348_v33 = vpop.f32.mrf.mxu1 }
  0xe9   :  { %498 = vst [vmem:[#allocation7 + $0x28] sm:$0xff] %v277_v32  ;;  %500 = vst [vmem:[#allocation7 + $0x38] sm:$0xff] %v348_v33 }
  0xec   :  { %v417_v34 = vpop.f32.mrf.mxu0  ;;  %v488_v35 = vpop.f32.mrf.mxu1 }
  0xed   :  { %501 = vst [vmem:[#allocation7 + $0x40] sm:$0xff] %v417_v34  ;;  %503 = vst [vmem:[#allocation7 + $0x50] sm:$0xff] %v488_v35 }
  0xee   :  { %v419_v36 = vpop.f32.mrf.mxu0  ;;  %v490_v37 = vpop.f32.mrf.mxu1 }
  0xef   :  { %502 = vst [vmem:[#allocation7 + $0x48] sm:$0xff] %v419_v36  ;;  %504 = vst [vmem:[#allocation7 + $0x58] sm:$0xff] %v490_v37 }
  0xf0   :  { %584 = shalt.err (!%p581_p0)
}
  0xf1   :  { %514 = dma.vmem_to_hbm [thread:$0]  %s512_s1, 1536, %s637_s2, [#allocation4]  }
  0xf2   :  { %597 = dma.done.wait [#allocation4], 1536  }
  0xf3   :  { %598 = vsyncadd [#allocation4], 4294965760 }
  0xf4   :  { %518 = vsyncpa [#allocation3], 1 }
  0xf5   :  { %519 = vsyncpa [#allocation6], 1 }
  0xf6   :  { %520 = vsyncpa [#allocation4], 1 }

</bundles_post_ra>
